<compile_context>
chip_gen: v5e
topology: v5e:2x2
jax: 0.10.0
libtpu: 0.0.40
codegen_flags: <defaults>
</compile_context>

<pallas_src>
import math
import functools

import numpy as np
import jax
import jax.numpy as jnp
from jax.experimental import pallas as pl
from jax.experimental.pallas import tpu as pltpu


def build_pe_table(embedding_dim: int, max_seq_length: int) -> jnp.ndarray:
    """Exact reproduction of the PyTorch __init__ double loop (vectorized).

    Note: like the PyTorch module, this assumes an even embedding_dim, and it
    intentionally uses different exponents for the sin/cos of a pair
    (2*i/d vs (2*i+1)/d) to match the reference module, not the canonical
    Vaswani encoding.
    """
    d = embedding_dim
    assert d % 2 == 0, "embedding_dim must be even (as in the PyTorch module)"
    pos = np.arange(max_seq_length, dtype=np.float64)[:, None]      # (L, 1)
    i_even = np.arange(0, d, 2, dtype=np.float64)[None, :]          # (1, d/2)
    pe = np.zeros((max_seq_length, d), dtype=np.float64)
    pe[:, 0::2] = np.sin(pos / (10000.0 ** (2.0 * i_even / d)))
    pe[:, 1::2] = np.cos(pos / (10000.0 ** ((2.0 * i_even + 1.0) / d)))
    return jnp.asarray(pe[None, :, :], dtype=jnp.float32)           # (1, L, d)


def _pos_enc_kernel(*refs, scale, dropout_p, use_dropout):
    # Blocks (flattened layout):
    #   x_ref : (B, TC)   pe_ref : (1, TC)   [u_ref : (B, TC)]   o_ref : (B, TC)
    if use_dropout:
        x_ref, pe_ref, u_ref, o_ref = refs
    else:
        x_ref, pe_ref, o_ref = refs

    xv = x_ref[...]
    # pe block is (1, TC) and broadcasts over the B rows in-register.
    y = xv * jnp.asarray(scale, xv.dtype) + pe_ref[...]

    if use_dropout:
        # keep iff uniform >= p ; surviving values scaled by 1/(1-p).
        keep = u_ref[...] >= jnp.float32(dropout_p)
        inv_keep = jnp.asarray(1.0 / (1.0 - dropout_p), y.dtype)
        y = jnp.where(keep, y * inv_keep, jnp.zeros_like(y))

    o_ref[...] = y.astype(o_ref.dtype)


def _pick_col_tile(n_cols: int, n_rows: int, bytes_per_elem: int,
                   max_tile_bytes: int = 2 * 1024 * 1024) -> int:
    """Largest lane-aligned (multiple-of-128) column tile that divides n_cols
    and keeps one (n_rows, tile) buffer under ~max_tile_bytes."""
    max_elems = max(128, max_tile_bytes // max(1, n_rows * bytes_per_elem))
    if n_cols <= max_elems:
        return n_cols
    tc = (max_elems // 128) * 128
    while tc >= 128:
        if n_cols % tc == 0:
            return tc
        tc -= 128
    # No lane-aligned divisor: fall back to a single full-row block.
    return n_cols


def positional_encoder(x, pe_table, *, dropout_p=0.1, train=False, rng_key=None):
    """x: (B, S, D). pe_table: (1, max_seq, D) float32."""
    B, S, D = x.shape
    assert pe_table.shape[2] == D and pe_table.shape[1] >= S

    n_cols = S * D
    x2 = x.reshape(B, n_cols)                                  # lane-dense view
    pe2 = pe_table[:, :S, :].reshape(1, n_cols).astype(x.dtype)
    scale = math.sqrt(D)

    use_dropout = bool(train) and float(dropout_p) > 0.0

    bytes_per = jnp.dtype(x.dtype).itemsize
    tc = _pick_col_tile(n_cols, B, bytes_per)
    grid = (n_cols // tc,)

    in_specs = [
        pl.BlockSpec((B, tc), lambda j: (0, j)),               # x
        pl.BlockSpec((1, tc), lambda j: (0, j)),               # pe (read once)
    ]
    operands = [x2, pe2]

    if use_dropout:
        assert rng_key is not None, "training mode needs an rng_key"
        u = jax.random.uniform(rng_key, (B, n_cols), dtype=jnp.float32)
        in_specs.append(pl.BlockSpec((B, tc), lambda j: (0, j)))
        operands.append(u)

    kernel = functools.partial(
        _pos_enc_kernel,
        scale=scale,
        dropout_p=float(dropout_p),
        use_dropout=use_dropout,
    )

    out2 = pl.pallas_call(
        kernel,
        out_shape=jax.ShapeDtypeStruct((B, n_cols), x.dtype),
        grid_spec=pltpu.PrefetchScalarGridSpec(
            num_scalar_prefetch=0,
            grid=grid,
            in_specs=in_specs,
            out_specs=pl.BlockSpec((B, tc), lambda j: (0, j)),
        ),
        compiler_params=pltpu.CompilerParams(
            dimension_semantics=("parallel",),     # no carried state -> shard on v7x
            vmem_limit_bytes=32 * 1024 * 1024,     # explicit: fits v5e/v6e/v7x
        ),
    )(*operands)

    return out2.reshape(B, S, D)


if __name__ == "__main__":
    B, S, D = 2, 8, 32
    max_seq_length = 64

    key = jax.random.PRNGKey(0)
    kx, kd = jax.random.split(key)
    x = jax.random.normal(kx, (B, S, D), dtype=jnp.float32)

    pe_table = build_pe_table(embedding_dim=D, max_seq_length=max_seq_length)

    # Eval mode (deterministic): y = x * sqrt(D) + pe[:, :S]
    y = jax.block_until_ready(
        positional_encoder(x, pe_table, dropout_p=0.1, train=False)
    )
    y_ref = x * math.sqrt(D) + pe_table[:, :S, :]
    assert jnp.allclose(y, y_ref, atol=1e-5, rtol=1e-5), "mismatch vs reference"

    # Training mode: in-kernel mask-and-scale dropout (uniforms from jax.random).
    p = 0.1
    y_train = jax.block_until_ready(
        positional_encoder(x, pe_table, dropout_p=p, train=True, rng_key=kd)
    )
    assert y_train.shape == x.shape
    assert bool(jnp.isfinite(y_train).all())
    # Surviving elements must equal y_ref / (1 - p); dropped elements are 0.
    kept = y_train != 0.0
    assert jnp.allclose(
        jnp.where(kept, y_train * (1.0 - p), y_ref), y_ref, atol=1e-4, rtol=1e-4
    ), "dropout path mismatch"

    print("KERNEL_OK")
</pallas_src>

<mosaic_0001>
module attributes {stable_mosaic.version = 11 : i64} {
  func.func @_pos_enc_kernel(%arg0: i32, %arg1: memref<2x256xf32, #tpu.memory_space<vmem>>, %arg2: memref<1x256xf32, #tpu.memory_space<vmem>>, %arg3: memref<2x256xf32, #tpu.memory_space<vmem>>) attributes {dimension_semantics = [#tpu.dimension_semantics<parallel>], iteration_bounds = array<i64: 1>, scalar_prefetch = 0 : i64, scratch_operands = 0 : i64, tpu.core_type = #tpu.core_type<tc>, window_params = [{transform_indices = @transform_0, window_bounds = array<i64: 2, 256>}, {transform_indices = @transform_1, window_bounds = array<i64: 1, 256>}, {transform_indices = @transform_2, window_bounds = array<i64: 2, 256>}]} {
    %c0 = arith.constant 0 : index
    %c0_0 = arith.constant 0 : index
    %0 = vector.load %arg1[%c0, %c0_0] : memref<2x256xf32, #tpu.memory_space<vmem>>, vector<2x256xf32>
    %cst = arith.constant 5.65685415 : f32
    %1 = vector.broadcast %cst : f32 to vector<2x256xf32>
    %2 = arith.mulf %0, %1 : vector<2x256xf32>
    %c0_1 = arith.constant 0 : index
    %c0_2 = arith.constant 0 : index
    %3 = vector.load %arg2[%c0_1, %c0_2] : memref<1x256xf32, #tpu.memory_space<vmem>>, vector<1x256xf32>
    %4 = vector.broadcast %3 : vector<1x256xf32> to vector<2x256xf32>
    %5 = arith.addf %2, %4 : vector<2x256xf32>
    %c0_3 = arith.constant 0 : index
    %c0_4 = arith.constant 0 : index
    %6 = vector.load %arg3[%c0_3, %c0_4] : memref<2x256xf32, #tpu.memory_space<vmem>>, vector<2x256xf32>
    tpu.vector_store %arg3[%c0_3, %c0_4], %5 {strides = array<i32>} : memref<2x256xf32, #tpu.memory_space<vmem>>, vector<2x256xf32>,
    return
  }
  func.func @transform_0(%arg0: i32) -> (i32, i32) {
    %c0_i32 = arith.constant 0 : i32
    %c0_i32_0 = arith.constant 0 : i32
    return %c0_i32, %arg0 : i32, i32
  }
  func.func @transform_1(%arg0: i32) -> (i32, i32) {
    %c0_i32 = arith.constant 0 : i32
    %c0_i32_0 = arith.constant 0 : i32
    return %c0_i32, %arg0 : i32, i32
  }
  func.func @transform_2(%arg0: i32) -> (i32, i32) {
    %c0_i32 = arith.constant 0 : i32
    %c0_i32_0 = arith.constant 0 : i32
    return %c0_i32, %arg0 : i32, i32
  }
}

</mosaic_0001>

<bundles_post_ra>
// kernel: tpu_custom_call.1
= control target key start
LH: loop header
LB: loop body
LE: loop exit
PB: predicated region body
PF: predicated region fallthrough
CT: control target
= control target key end

     0   :  { %7 = vsyncpa [#allocation3], 0  ;;  %s178_s0 = inlined_call_operand.hbm [shape: f32[2,256], index: 0, kind: input, shape index: {}]   ;;  %s179_s1 = inlined_call_operand.hbm [shape: f32[1,256], index: 1, kind: input, shape index: {}]   ;;  %s180_s2 = inlined_call_operand.hbm [shape: f32[2,256], index: 2, kind: output, shape index: {}]  }
   0x1   :  { %8 = vsyncpa [#allocation6], 0 }
   0x2   :  { %9 = vsyncpa [#allocation4], 0  ;;  %s15_s11 = sshll.u32 %s178_s0, 4  ;;  %s151_s12 = smov [#allocation2]   ;;  %s16_s11 = int_to_ptr.hbm [resolvable:$true] %s15_s11 }
   0x3   :  { %s17_s13 = sshll.u32 %s151_s12, 4  ;;  %s26_s16 = sshll.u32 %s179_s1, 4  ;;  %s18_s13 = int_to_ptr.vmem [resolvable:$true] %s17_s13  ;;  %s27_s16 = int_to_ptr.hbm [resolvable:$true] %s26_s16 }
   0x4   :  { %20 = dma.hbm_to_vmem [thread:$0]  %s16_s11, 64, %s18_s13, [#allocation3]  }
   0x5   :  { %s152_s17 = smov [#allocation5]  }
   0x6   :  { %s28_s18 = sshll.u32 %s152_s17, 4  ;;  %s29_s18 = int_to_ptr.vmem [resolvable:$true] %s28_s18 }
   0x7   :  { %31 = dma.hbm_to_vmem [thread:$0]  %s27_s16, 32, %s29_s18, [#allocation6]  }
   0x8   :  { %145 = dma.done.wait [#allocation3], 64  }
   0x9   :  { %146 = vsyncadd [#allocation3], 4294967232 }
   0xa   :  { %147 = dma.done.wait [#allocation6], 32  }
   0xb   :  { %148 = vsyncadd [#allocation6], 4294967264  ;;  %v40_v0 = vld [vmem:[#allocation2] sm:$0xf]  ;;  %v42_v1 = vld [vmem:[#allocation5] sm:$0x3] }
   0xc   :  { %v44_v2 = vperm.slane %v42_v1, 0  ;;  %v45_v3 = vperm.slane %v42_v1, 1  ;;  %v41_v4 = vmul.f32 5.656854, %v40_v0  ;;  %vm47_vm0 = vcmask 1041408   ;;  %s153_s0 = smov [#allocation7]  }
   0xd   :  { %s57_s19 = sshll.u32 %s153_s0, 4  ;;  %s59_s21 = sshll.u32 %s180_s2, 4  ;;  %s58_s19 = int_to_ptr.vmem [resolvable:$true] %s57_s19  ;;  %s60_s21 = int_to_ptr.hbm [resolvable:$true] %s59_s21 }
   0xe   :  { %v46_v5 = vrot.slane %v45_v3, 6 }
  0x10   :  { %v48_v6 = vsel %vm47_vm0, %v44_v2, %v46_v5 }
  0x11   :  { %v50_v7 = vadd.f32 %v48_v6, %v41_v4 }
  0x13   :  { %51 = vst [vmem:[#allocation7] sm:$0xf] %v50_v7 }
  0x14   :  { %62 = dma.vmem_to_hbm [thread:$0]  %s58_s19, 64, %s60_s21, [#allocation4]  }
  0x15   :  { %149 = dma.done.wait [#allocation4], 64  }
  0x16   :  { %150 = vsyncadd [#allocation4], 4294967232 }
  0x17   :  { %67 = vsyncpa [#allocation3], 1 }
  0x18   :  { %68 = vsyncpa [#allocation6], 1 }
  0x19   :  { %69 = vsyncpa [#allocation4], 1 }

</bundles_post_ra>
